<compile_context>
chip_gen: v7x
topology: tpu7x:2x2x1
jax: 0.10.0
libtpu: 0.0.40
codegen_flags: <defaults>
</compile_context>

<pallas_src>
import functools
from itertools import product

import jax
import jax.numpy as jnp
import numpy as np
from jax import lax
from jax.experimental import pallas as pl
from jax.experimental.pallas import tpu as pltpu


# ----------------------------------------------------------------------------
# Prior-box construction (identical to the PyTorch __init__)
# ----------------------------------------------------------------------------
def make_prior_boxes(input_size, feat_levels):
    H, W = input_size
    strides = [2 ** i for i in feat_levels]
    prior_boxes = []
    for stride in strides:
        for cy, cx in product(range(stride // 2, H, stride),
                              range(stride // 2, W, stride)):
            for aspect in [0.5, 1.0, 2.0]:
                for scale in [0, 1 / 3, 2 / 3]:
                    h = 4 * stride * pow(2, scale) * pow(aspect, 1 / 2)
                    w = 4 * stride * pow(2, scale) * pow(1 / aspect, 1 / 2)
                    prior_boxes.append([cx, cy, w, h])
    return np.asarray(prior_boxes, dtype=np.float32)  # (P, 4) cxcywh


# ----------------------------------------------------------------------------
# Pallas kernel (one image per grid step)
# ----------------------------------------------------------------------------
def encoder_kernel(gt_cols_ref, gt_rows_ref, priors_ref, out_ref,
                   *, neg_thresh, pos_thresh):
    gt = gt_cols_ref[...]        # (N, 8)
    attrs = gt_rows_ref[...]     # (8, N)   rows: cx, cy, w, h, label
    pri = priors_ref[...]        # (16, P_pad)

    N = gt.shape[0]
    P_pad = pri.shape[1]

    # GT columns, (N, 1)
    bx1 = gt[:, 0:1]
    by1 = gt[:, 1:2]
    bx2 = gt[:, 2:3]
    by2 = gt[:, 3:4]
    area_b = gt[:, 4:5]

    # Prior rows, (1, P_pad) / (2, P_pad) — all precomputed in the wrapper.
    px1 = pri[0:1, :]
    py1 = pri[1:2, :]
    px2 = pri[2:3, :]
    py2 = pri[3:4, :]
    area_p = pri[4:5, :]
    pcxy = pri[5:7, :]           # [pcx, pcy]
    inv_pwh = pri[7:9, :]        # [1/pw, 1/ph]

    # ------------------------------------------------------------------
    # pairwise IoU (N, P_pad) — exact division kept for threshold fidelity
    # ------------------------------------------------------------------
    iw = jnp.maximum(jnp.minimum(bx2, px2) - jnp.maximum(bx1, px1), 0.0)
    ih = jnp.maximum(jnp.minimum(by2, py2) - jnp.maximum(by1, py1), 0.0)
    inter = iw * ih
    union = area_b + area_p - inter
    ious = inter / union                                             # (N, P_pad)

    row_idx = lax.broadcasted_iota(jnp.int32, (N, P_pad), 0)
    col_idx = lax.broadcasted_iota(jnp.int32, (N, P_pad), 1)

    # max / argmax over GT axis per prior (first occurrence on ties)
    max_ious = jnp.max(ious, axis=0, keepdims=True)                  # (1, P_pad)
    match_ids = jnp.min(jnp.where(ious == max_ious, row_idx, N),
                        axis=0, keepdims=True)                       # (1, P_pad)

    # argmax over prior axis per GT (first occurrence on ties)
    row_max = jnp.max(ious, axis=1, keepdims=True)                   # (N, 1)
    force_ids = jnp.min(jnp.where(ious == row_max, col_idx, P_pad),
                        axis=1, keepdims=True)                       # (N, 1)

    # forced assignment: match_ids[force_ids[i]] = i, max_ious[...] = pos_thresh
    # Duplicate resolution: largest GT index wins (== PyTorch's sequential
    # last-write behaviour of `match_ids[force] = arange(N)`).
    forced = force_ids == col_idx                                    # (N, P_pad)
    assigned_gt = jnp.max(jnp.where(forced, row_idx, -1),
                          axis=0, keepdims=True)                     # (1, P_pad)
    has_forced = assigned_gt >= 0
    match_ids = jnp.where(has_forced, assigned_gt, match_ids)
    max_ious = jnp.where(has_forced, pos_thresh, max_ious)

    # ------------------------------------------------------------------
    # gather matched GT attrs with one MXU matmul (exact: one-hot columns)
    # ------------------------------------------------------------------
    onehot = (match_ids == row_idx).astype(jnp.float32)              # (N, P_pad)
    g = jnp.dot(attrs, onehot,
                preferred_element_type=jnp.float32,
                precision=lax.Precision.HIGHEST)                     # (8, P_pad)
    # rows of g: 0=cx, 1=cy, 2=w, 3=h, 4=label

    # bbox2delta (divide-free: precomputed reciprocals, *10 / *5)
    dcxy = (g[0:2, :] - pcxy) * inv_pwh * 10.0                       # (2, P_pad)
    dwh = jnp.log(g[2:4, :] * inv_pwh) * 5.0                         # (2, P_pad)

    cls = g[4:5, :]                                                  # (1, P_pad)
    cls = jnp.where(max_ious < pos_thresh, -1.0, cls)
    cls = jnp.where(max_ious < neg_thresh, 0.0, cls)

    # direct sublane-row stores into the fused output slab
    out_ref[0:2, :] = dcxy
    out_ref[2:4, :] = dwh
    out_ref[4:5, :] = cls
    out_ref[5:8, :] = jnp.zeros((3, P_pad), jnp.float32)


# ----------------------------------------------------------------------------
# Wrappers
# ----------------------------------------------------------------------------
def efficient_encoder_batched(bboxes, labels, priors_cxcywh,
                              iou_threshs=(0.4, 0.5)):
    """bboxes: (B, N, 4) xyxy f32; labels: (B, N) int -> ((B,P,4), (B,P))."""
    neg_thresh, pos_thresh = iou_threshs
    bboxes = jnp.asarray(bboxes, jnp.float32)
    labels = jnp.asarray(labels)
    B, N, _ = bboxes.shape

    priors = jnp.asarray(priors_cxcywh, jnp.float32)                 # (P, 4)
    P = priors.shape[0]
    P_pad = max(128, ((P + 127) // 128) * 128)

    # --- static prior precompute (padded lanes = safe dummy priors) ---------
    pad = jnp.tile(jnp.asarray([[1e4, 1e4, 1.0, 1.0]], jnp.float32),
                   (P_pad - P, 1))
    prip = jnp.concatenate([priors, pad], axis=0)                    # (P_pad, 4)
    pcx, pcy, pw, ph = prip[:, 0], prip[:, 1], prip[:, 2], prip[:, 3]
    px1 = pcx - 0.5 * pw
    py1 = pcy - 0.5 * ph
    px2 = pcx + 0.5 * pw
    py2 = pcy + 0.5 * ph
    area_p = (px2 - px1) * (py2 - py1)       # same formula as torchvision box_area
    inv_pw = 1.0 / pw
    inv_ph = 1.0 / ph
    prior_rows = jnp.stack([px1, py1, px2, py2, area_p,
                            pcx, pcy, inv_pw, inv_ph], axis=0)       # (9, P_pad)
    prior_mat = jnp.zeros((16, P_pad), jnp.float32).at[:9].set(prior_rows)

    # --- per-image GT precompute --------------------------------------------
    x1, y1 = bboxes[..., 0], bboxes[..., 1]
    x2, y2 = bboxes[..., 2], bboxes[..., 3]
    area_b = (x2 - x1) * (y2 - y1)
    cx = 0.5 * (x1 + x2)
    cy = 0.5 * (y1 + y2)
    w = x2 - x1
    h = y2 - y1
    z = jnp.zeros_like(x1)
    gt_cols = jnp.stack([x1, y1, x2, y2, area_b, z, z, z], axis=-1)  # (B, N, 8)
    gt_rows = jnp.stack([cx, cy, w, h, labels.astype(jnp.float32),
                         z, z, z], axis=1)                           # (B, 8, N)

    kernel = functools.partial(encoder_kernel,
                               neg_thresh=float(neg_thresh),
                               pos_thresh=float(pos_thresh))

    # Tiny per-step working set (< ~150 KB), so no vmem_limit override needed.
    out = pl.pallas_call(
        kernel,
        out_shape=jax.ShapeDtypeStruct((B, 8, P_pad), jnp.float32),
        grid=(B,),
        in_specs=[
            pl.BlockSpec((None, N, 8), lambda b: (b, 0, 0)),
            pl.BlockSpec((None, 8, N), lambda b: (b, 0, 0)),
            pl.BlockSpec((16, P_pad), lambda b: (0, 0)),
        ],
        out_specs=pl.BlockSpec((None, 8, P_pad), lambda b: (b, 0, 0)),
        compiler_params=pltpu.CompilerParams(
            dimension_semantics=("parallel",)),
    )(gt_cols, gt_rows, prior_mat)

    reg_targets = jnp.transpose(out[:, 0:4, :P], (0, 2, 1))          # (B, P, 4)
    cls_targets = out[:, 4, :P].astype(jnp.int32)                    # (B, P)
    return reg_targets, cls_targets


def efficient_encoder(bboxes, labels, priors_cxcywh, iou_threshs=(0.4, 0.5)):
    """Single-image convenience wrapper matching the PyTorch forward."""
    reg, cls = efficient_encoder_batched(bboxes[None], labels[None],
                                         priors_cxcywh, iou_threshs)
    return reg[0], cls[0]


# ----------------------------------------------------------------------------
# Pure-JAX reference (mirrors the PyTorch forward; deterministic tie handling)
# ----------------------------------------------------------------------------
def reference(bboxes, labels, priors, iou_threshs=(0.4, 0.5)):
    neg_thresh, pos_thresh = iou_threshs
    N = bboxes.shape[0]
    P = priors.shape[0]
    p_xyxy = jnp.stack([priors[:, 0] - 0.5 * priors[:, 2],
                        priors[:, 1] - 0.5 * priors[:, 3],
                        priors[:, 0] + 0.5 * priors[:, 2],
                        priors[:, 1] + 0.5 * priors[:, 3]], axis=-1)
    lt = jnp.maximum(bboxes[:, None, :2], p_xyxy[None, :, :2])
    rb = jnp.minimum(bboxes[:, None, 2:], p_xyxy[None, :, 2:])
    wh = jnp.clip(rb - lt, 0.0)
    inter = wh[..., 0] * wh[..., 1]
    area_b = (bboxes[:, 2] - bboxes[:, 0]) * (bboxes[:, 3] - bboxes[:, 1])
    area_p = (p_xyxy[:, 2] - p_xyxy[:, 0]) * (p_xyxy[:, 3] - p_xyxy[:, 1])
    ious = inter / (area_b[:, None] + area_p[None, :] - inter)

    max_ious = ious.max(axis=0)
    match_ids = ious.argmax(axis=0)
    force = ious.argmax(axis=1)                                      # (N,)

    # PyTorch `match_ids[force] = arange(N)` applies writes sequentially, so
    # for duplicate force indices the LARGEST GT index wins.  XLA's scatter
    # leaves duplicates unspecified, so encode the rule explicitly.
    forced = force[:, None] == jnp.arange(P)[None, :]                # (N, P)
    assigned = jnp.max(jnp.where(forced, jnp.arange(N)[:, None], -1), axis=0)
    match_ids = jnp.where(assigned >= 0, assigned, match_ids)
    max_ious = jnp.where(assigned >= 0, pos_thresh, max_ious)

    cxcywh = jnp.stack([(bboxes[:, 0] + bboxes[:, 2]) / 2,
                        (bboxes[:, 1] + bboxes[:, 3]) / 2,
                        bboxes[:, 2] - bboxes[:, 0],
                        bboxes[:, 3] - bboxes[:, 1]], axis=-1)
    g = cxcywh[match_ids]
    dcx = (g[:, 0] - priors[:, 0]) / priors[:, 2] / 0.1
    dcy = (g[:, 1] - priors[:, 1]) / priors[:, 3] / 0.1
    dw = jnp.log(g[:, 2] / priors[:, 2]) / 0.2
    dh = jnp.log(g[:, 3] / priors[:, 3]) / 0.2
    reg = jnp.stack([dcx, dcy, dw, dh], axis=-1)

    cls = labels[match_ids]
    cls = jnp.where(max_ious < pos_thresh, -1, cls)
    cls = jnp.where(max_ious < neg_thresh, 0, cls)
    return reg, cls


if __name__ == "__main__":
    input_size = [32, 32]
    feat_levels = [3, 4, 5]
    iou_threshs = (0.4, 0.5)

    priors = jnp.asarray(make_prior_boxes(input_size, feat_levels))  # (189, 4)
    B, N = 4, 8

    key = jax.random.PRNGKey(0)
    k1, k2, k3 = jax.random.split(key, 3)
    xy1 = jax.random.uniform(k1, (B, N, 2), minval=0.0, maxval=20.0)
    wh = jax.random.uniform(k2, (B, N, 2), minval=4.0, maxval=12.0)
    xy2 = jnp.minimum(xy1 + wh, float(input_size[0]))
    bboxes = jnp.concatenate([xy1, xy2], axis=-1).astype(jnp.float32)  # (B,N,4)
    labels = jax.random.randint(k3, (B, N), 1, 10).astype(jnp.int32)   # (B,N)

    reg_targets, cls_targets = efficient_encoder_batched(
        bboxes, labels, priors, iou_threshs)
    jax.block_until_ready((reg_targets, cls_targets))

    for b in range(B):
        reg_ref, cls_ref = reference(bboxes[b], labels[b], priors, iou_threshs)
        np.testing.assert_allclose(np.asarray(reg_targets[b]),
                                   np.asarray(reg_ref),
                                   rtol=1e-4, atol=1e-4)
        np.testing.assert_array_equal(np.asarray(cls_targets[b]),
                                      np.asarray(cls_ref))

    print("KERNEL_OK")
</pallas_src>

<mosaic_0001>
module attributes {stable_mosaic.version = 11 : i64} {
  func.func @encoder_kernel(%arg0: i32, %arg1: memref<1x8x8xf32, #tpu.memory_space<vmem>>, %arg2: memref<1x8x8xf32, #tpu.memory_space<vmem>>, %arg3: memref<16x256xf32, #tpu.memory_space<vmem>>, %arg4: memref<1x8x256xf32, #tpu.memory_space<vmem>>) attributes {dimension_semantics = [#tpu.dimension_semantics<parallel>], iteration_bounds = array<i64: 4>, scalar_prefetch = 0 : i64, scratch_operands = 0 : i64, tpu.core_type = #tpu.core_type<tc>, window_params = [{transform_indices = @transform_0, window_bounds = array<i64: 1, 8, 8>}, {transform_indices = @transform_1, window_bounds = array<i64: 1, 8, 8>}, {pipeline_mode = #tpu.pipeline_mode<synchronous>, transform_indices = @transform_2, window_bounds = array<i64: 16, 256>}, {transform_indices = @transform_3, window_bounds = array<i64: 1, 8, 256>}]} {
    %c0 = arith.constant 0 : index
    %c0_0 = arith.constant 0 : index
    %c0_1 = arith.constant 0 : index
    %0 = vector.load %arg1[%c0, %c0_0, %c0_1] : memref<1x8x8xf32, #tpu.memory_space<vmem>>, vector<1x8x8xf32>
    %1 = vector.shape_cast %0 : vector<1x8x8xf32> to vector<8x8xf32>
    %c0_2 = arith.constant 0 : index
    %c0_3 = arith.constant 0 : index
    %c0_4 = arith.constant 0 : index
    %2 = vector.load %arg2[%c0_2, %c0_3, %c0_4] : memref<1x8x8xf32, #tpu.memory_space<vmem>>, vector<1x8x8xf32>
    %3 = vector.shape_cast %2 : vector<1x8x8xf32> to vector<8x8xf32>
    %c0_5 = arith.constant 0 : index
    %c0_6 = arith.constant 0 : index
    %4 = vector.load %arg3[%c0_5, %c0_6] : memref<16x256xf32, #tpu.memory_space<vmem>>, vector<16x256xf32>
    %5 = vector.extract_strided_slice %1 {offsets = [0, 0], sizes = [8, 1], strides = [1, 1]} : vector<8x8xf32> to vector<8x1xf32>
    %6 = vector.extract_strided_slice %1 {offsets = [0, 1], sizes = [8, 1], strides = [1, 1]} : vector<8x8xf32> to vector<8x1xf32>
    %7 = vector.extract_strided_slice %1 {offsets = [0, 2], sizes = [8, 1], strides = [1, 1]} : vector<8x8xf32> to vector<8x1xf32>
    %8 = vector.extract_strided_slice %1 {offsets = [0, 3], sizes = [8, 1], strides = [1, 1]} : vector<8x8xf32> to vector<8x1xf32>
    %9 = vector.extract_strided_slice %1 {offsets = [0, 4], sizes = [8, 1], strides = [1, 1]} : vector<8x8xf32> to vector<8x1xf32>
    %10 = vector.extract_strided_slice %4 {offsets = [0, 0], sizes = [1, 256], strides = [1, 1]} : vector<16x256xf32> to vector<1x256xf32>
    %11 = vector.extract_strided_slice %4 {offsets = [1, 0], sizes = [1, 256], strides = [1, 1]} : vector<16x256xf32> to vector<1x256xf32>
    %12 = vector.extract_strided_slice %4 {offsets = [2, 0], sizes = [1, 256], strides = [1, 1]} : vector<16x256xf32> to vector<1x256xf32>
    %13 = vector.extract_strided_slice %4 {offsets = [3, 0], sizes = [1, 256], strides = [1, 1]} : vector<16x256xf32> to vector<1x256xf32>
    %14 = vector.extract_strided_slice %4 {offsets = [4, 0], sizes = [1, 256], strides = [1, 1]} : vector<16x256xf32> to vector<1x256xf32>
    %15 = vector.extract_strided_slice %4 {offsets = [5, 0], sizes = [2, 256], strides = [1, 1]} : vector<16x256xf32> to vector<2x256xf32>
    %16 = vector.extract_strided_slice %4 {offsets = [7, 0], sizes = [2, 256], strides = [1, 1]} : vector<16x256xf32> to vector<2x256xf32>
    %17 = vector.broadcast %7 : vector<8x1xf32> to vector<8x256xf32>
    %18 = vector.broadcast %12 : vector<1x256xf32> to vector<8x256xf32>
    %19 = arith.minimumf %17, %18 : vector<8x256xf32>
    %20 = vector.broadcast %5 : vector<8x1xf32> to vector<8x256xf32>
    %21 = vector.broadcast %10 : vector<1x256xf32> to vector<8x256xf32>
    %22 = arith.maximumf %20, %21 : vector<8x256xf32>
    %23 = arith.subf %19, %22 : vector<8x256xf32>
    %cst = arith.constant 0.000000e+00 : f32
    %24 = vector.broadcast %cst : f32 to vector<8x256xf32>
    %25 = arith.maximumf %23, %24 : vector<8x256xf32>
    %26 = vector.broadcast %8 : vector<8x1xf32> to vector<8x256xf32>
    %27 = vector.broadcast %13 : vector<1x256xf32> to vector<8x256xf32>
    %28 = arith.minimumf %26, %27 : vector<8x256xf32>
    %29 = vector.broadcast %6 : vector<8x1xf32> to vector<8x256xf32>
    %30 = vector.broadcast %11 : vector<1x256xf32> to vector<8x256xf32>
    %31 = arith.maximumf %29, %30 : vector<8x256xf32>
    %32 = arith.subf %28, %31 : vector<8x256xf32>
    %cst_7 = arith.constant 0.000000e+00 : f32
    %33 = vector.broadcast %cst_7 : f32 to vector<8x256xf32>
    %34 = arith.maximumf %32, %33 : vector<8x256xf32>
    %35 = arith.mulf %25, %34 : vector<8x256xf32>
    %36 = vector.broadcast %9 : vector<8x1xf32> to vector<8x256xf32>
    %37 = vector.broadcast %14 : vector<1x256xf32> to vector<8x256xf32>
    %38 = arith.addf %36, %37 : vector<8x256xf32>
    %39 = arith.subf %38, %35 : vector<8x256xf32>
    %40 = arith.divf %35, %39 : vector<8x256xf32>
    %41 = tpu.iota {dimensions = array<i32: 0>} : vector<8x256xi32>
    %42 = tpu.iota {dimensions = array<i32: 1>} : vector<8x256xi32>
    %cst_8 = arith.constant dense<0xFF800000> : vector<256xf32>
    %43 = vector.multi_reduction <maximumf>, %40, %cst_8 [0] : vector<8x256xf32> to vector<256xf32>
    %44 = vector.shape_cast %43 : vector<256xf32> to vector<1x256xf32>
    %45 = vector.broadcast %44 : vector<1x256xf32> to vector<8x256xf32>
    %46 = arith.cmpf oeq, %40, %45 : vector<8x256xf32>
    %c8_i32 = arith.constant 8 : i32
    %47 = vector.broadcast %c8_i32 : i32 to vector<8x256xi32>
    %48 = arith.select %46, %41, %47 : vector<8x256xi1>, vector<8x256xi32>
    %cst_9 = arith.constant dense<2147483647> : vector<256xi32>
    %49 = vector.multi_reduction <minsi>, %48, %cst_9 [0] : vector<8x256xi32> to vector<256xi32>
    %50 = vector.shape_cast %49 : vector<256xi32> to vector<1x256xi32>
    %cst_10 = arith.constant dense<0xFF800000> : vector<8xf32>
    %51 = vector.multi_reduction <maximumf>, %40, %cst_10 [1] : vector<8x256xf32> to vector<8xf32>
    %52 = vector.shape_cast %51 : vector<8xf32> to vector<8x1xf32>
    %53 = vector.broadcast %52 : vector<8x1xf32> to vector<8x256xf32>
    %54 = arith.cmpf oeq, %40, %53 : vector<8x256xf32>
    %c256_i32 = arith.constant 256 : i32
    %55 = vector.broadcast %c256_i32 : i32 to vector<8x256xi32>
    %56 = arith.select %54, %42, %55 : vector<8x256xi1>, vector<8x256xi32>
    %cst_11 = arith.constant dense<2147483647> : vector<8xi32>
    %57 = vector.multi_reduction <minsi>, %56, %cst_11 [1] : vector<8x256xi32> to vector<8xi32>
    %58 = vector.shape_cast %57 : vector<8xi32> to vector<8x1xi32>
    %59 = vector.broadcast %58 : vector<8x1xi32> to vector<8x256xi32>
    %60 = arith.cmpi eq, %59, %42 : vector<8x256xi32>
    %c-1_i32 = arith.constant -1 : i32
    %61 = vector.broadcast %c-1_i32 : i32 to vector<8x256xi32>
    %62 = arith.select %60, %41, %61 : vector<8x256xi1>, vector<8x256xi32>
    %cst_12 = arith.constant dense<-2147483648> : vector<256xi32>
    %63 = vector.multi_reduction <maxsi>, %62, %cst_12 [0] : vector<8x256xi32> to vector<256xi32>
    %64 = vector.shape_cast %63 : vector<256xi32> to vector<1x256xi32>
    %c0_i32 = arith.constant 0 : i32
    %65 = vector.broadcast %c0_i32 : i32 to vector<1x256xi32>
    %66 = arith.cmpi sge, %64, %65 : vector<1x256xi32>
    %67 = arith.select %66, %64, %50 : vector<1x256xi1>, vector<1x256xi32>
    %cst_13 = arith.constant 5.000000e-01 : f32
    %68 = vector.broadcast %cst_13 : f32 to vector<1x256xf32>
    %69 = arith.select %66, %68, %44 : vector<1x256xi1>, vector<1x256xf32>
    %70 = vector.broadcast %67 : vector<1x256xi32> to vector<8x256xi32>
    %71 = arith.cmpi eq, %70, %41 : vector<8x256xi32>
    %72 = arith.extui %71 : vector<8x256xi1> to vector<8x256xi32>
    %73 = arith.sitofp %72 : vector<8x256xi32> to vector<8x256xf32>
    %cst_14 = arith.constant dense<0.000000e+00> : vector<8x256xf32>
    %74 = tpu.matmul %3, %73, %cst_14 {dimension_numbers = #tpu.dot_dimension_numbers<[1], [0], [0], [1], [0, 0, 1, 1], [], []>, precision = #tpu.contract_precision<fp32>} : vector<8x8xf32>, vector<8x256xf32>, vector<8x256xf32> -> vector<8x256xf32>
    %75 = vector.extract_strided_slice %74 {offsets = [0, 0], sizes = [2, 256], strides = [1, 1]} : vector<8x256xf32> to vector<2x256xf32>
    %76 = arith.subf %75, %15 : vector<2x256xf32>
    %77 = arith.mulf %76, %16 : vector<2x256xf32>
    %cst_15 = arith.constant 1.000000e+01 : f32
    %78 = vector.broadcast %cst_15 : f32 to vector<2x256xf32>
    %79 = arith.mulf %77, %78 : vector<2x256xf32>
    %80 = vector.extract_strided_slice %74 {offsets = [2, 0], sizes = [2, 256], strides = [1, 1]} : vector<8x256xf32> to vector<2x256xf32>
    %81 = arith.mulf %80, %16 : vector<2x256xf32>
    %82 = math.log %81 : vector<2x256xf32>
    %cst_16 = arith.constant 5.000000e+00 : f32
    %83 = vector.broadcast %cst_16 : f32 to vector<2x256xf32>
    %84 = arith.mulf %82, %83 : vector<2x256xf32>
    %85 = vector.extract_strided_slice %74 {offsets = [4, 0], sizes = [1, 256], strides = [1, 1]} : vector<8x256xf32> to vector<1x256xf32>
    %cst_17 = arith.constant 5.000000e-01 : f32
    %86 = vector.broadcast %cst_17 : f32 to vector<1x256xf32>
    %87 = arith.cmpf olt, %69, %86 : vector<1x256xf32>
    %cst_18 = arith.constant -1.000000e+00 : f32
    %88 = vector.broadcast %cst_18 : f32 to vector<1x256xf32>
    %89 = arith.select %87, %88, %85 : vector<1x256xi1>, vector<1x256xf32>
    %cst_19 = arith.constant 4.000000e-01 : f32
    %90 = vector.broadcast %cst_19 : f32 to vector<1x256xf32>
    %91 = arith.cmpf olt, %69, %90 : vector<1x256xf32>
    %cst_20 = arith.constant 0.000000e+00 : f32
    %92 = vector.broadcast %cst_20 : f32 to vector<1x256xf32>
    %93 = arith.select %91, %92, %89 : vector<1x256xi1>, vector<1x256xf32>
    %c0_21 = arith.constant 0 : index
    %c0_22 = arith.constant 0 : index
    %c0_23 = arith.constant 0 : index
    %94 = vector.load %arg4[%c0_21, %c0_22, %c0_23] : memref<1x8x256xf32, #tpu.memory_space<vmem>>, vector<1x2x256xf32>
    %95 = vector.shape_cast %94 : vector<1x2x256xf32> to vector<2x256xf32>
    %96 = vector.shape_cast %79 : vector<2x256xf32> to vector<1x2x256xf32>
    tpu.vector_store %arg4[%c0_21, %c0_22, %c0_23], %96 {strides = array<i32>} : memref<1x8x256xf32, #tpu.memory_space<vmem>>, vector<1x2x256xf32>,
    %c0_24 = arith.constant 0 : index
    %c2 = arith.constant 2 : index
    %c0_25 = arith.constant 0 : index
    %97 = vector.load %arg4[%c0_24, %c2, %c0_25] : memref<1x8x256xf32, #tpu.memory_space<vmem>>, vector<1x2x256xf32>
    %98 = vector.shape_cast %97 : vector<1x2x256xf32> to vector<2x256xf32>
    %99 = vector.shape_cast %84 : vector<2x256xf32> to vector<1x2x256xf32>
    tpu.vector_store %arg4[%c0_24, %c2, %c0_25], %99 {strides = array<i32>} : memref<1x8x256xf32, #tpu.memory_space<vmem>>, vector<1x2x256xf32>,
    %c0_26 = arith.constant 0 : index
    %c4 = arith.constant 4 : index
    %c0_27 = arith.constant 0 : index
    %100 = vector.load %arg4[%c0_26, %c4, %c0_27] : memref<1x8x256xf32, #tpu.memory_space<vmem>>, vector<1x1x256xf32>
    %101 = vector.shape_cast %100 : vector<1x1x256xf32> to vector<1x256xf32>
    %102 = vector.shape_cast %93 : vector<1x256xf32> to vector<1x1x256xf32>
    tpu.vector_store %arg4[%c0_26, %c4, %c0_27], %102 {strides = array<i32>} : memref<1x8x256xf32, #tpu.memory_space<vmem>>, vector<1x1x256xf32>,
    %cst_28 = arith.constant 0.000000e+00 : f32
    %103 = vector.broadcast %cst_28 : f32 to vector<3x256xf32>
    %c0_29 = arith.constant 0 : index
    %c5 = arith.constant 5 : index
    %c0_30 = arith.constant 0 : index
    %104 = vector.load %arg4[%c0_29, %c5, %c0_30] : memref<1x8x256xf32, #tpu.memory_space<vmem>>, vector<1x3x256xf32>
    %105 = vector.shape_cast %104 : vector<1x3x256xf32> to vector<3x256xf32>
    %106 = vector.shape_cast %103 : vector<3x256xf32> to vector<1x3x256xf32>
    tpu.vector_store %arg4[%c0_29, %c5, %c0_30], %106 {strides = array<i32>} : memref<1x8x256xf32, #tpu.memory_space<vmem>>, vector<1x3x256xf32>,
    return
  }
  func.func @transform_0(%arg0: i32) -> (i32, i32, i32) {
    %c0_i32 = arith.constant 0 : i32
    %c0_i32_0 = arith.constant 0 : i32
    %c0_i32_1 = arith.constant 0 : i32
    return %arg0, %c0_i32, %c0_i32_0 : i32, i32, i32
  }
  func.func @transform_1(%arg0: i32) -> (i32, i32, i32) {
    %c0_i32 = arith.constant 0 : i32
    %c0_i32_0 = arith.constant 0 : i32
    %c0_i32_1 = arith.constant 0 : i32
    return %arg0, %c0_i32, %c0_i32_0 : i32, i32, i32
  }
  func.func @transform_2(%arg0: i32) -> (i32, i32) {
    %c0_i32 = arith.constant 0 : i32
    %c0_i32_0 = arith.constant 0 : i32
    %c0_i32_1 = arith.constant 0 : i32
    return %c0_i32, %c0_i32_0 : i32, i32
  }
  func.func @transform_3(%arg0: i32) -> (i32, i32, i32) {
    %c0_i32 = arith.constant 0 : i32
    %c0_i32_0 = arith.constant 0 : i32
    %c0_i32_1 = arith.constant 0 : i32
    return %arg0, %c0_i32, %c0_i32_0 : i32, i32, i32
  }
}

</mosaic_0001>

<bundles_post_ra>
// kernel: tpu_custom_call.1
= control target key start
LH: loop header
LB: loop body
LE: loop exit
PB: predicated region body
PF: predicated region fallthrough
CT: control target
= control target key end

     0   :  { %8 = vsyncpa [#allocation3], 0  ;;  %s1732_s0 = inlined_call_operand.hbm [shape: f32[4,8,8], index: 0, kind: input, shape index: {}]   ;;  %s1733_s1 = inlined_call_operand.hbm [shape: f32[4,8,8], index: 1, kind: input, shape index: {}]   ;;  %s1734_s2 = inlined_call_operand.hbm [shape: f32[16,256], index: 2, kind: input, shape index: {}]   ;;  %s1735_s3 = inlined_call_operand.hbm [shape: f32[4,8,256], index: 3, kind: output, shape index: {}]  }
   0x1   :  { %10 = vsyncpa [#allocation3 + $0x1], 0 }
   0x2   :  { %11 = vsyncpa [#allocation6], 0 }
   0x3   :  { %13 = vsyncpa [#allocation6 + $0x1], 0 }
   0x4   :  { %14 = vsyncpa [#allocation4], 0 }
   0x5   :  { %16 = vsyncpa [#allocation4 + $0x1], 0  ;;  %s1411_s12 = smov 0   ;;  %s1413_s13 = smov 0  }
   0x6   :  { %s1415_s14 = smov 0   ;;  %s1417_s15 = smov 0  }
   0x7 LB: > { %s1432_s16 = sadd.s32 4294967295, %s1375_s15   ;;  %s1089_s17 = sadd.s32 4294967294, %s1375_s15   ;;  %s1375_s15 = sphi %s1417_s15, %s1756_s15   ;;  %s1371_s14 = sphi %s1415_s14, %s1755_s14   ;;  %s1367_s13 = sphi %s1413_s13, %s1754_s13   ;;  %s1363_s12 = sphi %s1411_s12, %s1753_s12  }
   0x8   : > { %p42_p0 = scmp.ne.s32.totalorder %s1367_s13, %s1363_s12  ;;  %p1736_p1 = scmp.eq.s32.totalorder %s1432_s16, 0 }
   0x9   : > { %p119_p3 = scmp.eq.s32.totalorder %s1089_s17, 3  ;;  %p1090_p5 = scmp.ge.s32.totalorder %s1375_s15, 1 }
   0xa   : > { %p1441_p4 = por %p1736_p1, %p42_p0  ;;  %p126_p7 = scmp.lt.s32.totalorder %s1375_s15, 5 }
   0xb   : > { %p1446_p6 = por %p119_p3, %p42_p0  ;;  %s1377_s21 = smov [#allocation7]  }
   0xc   : > { %s1740_s18 = scalar_select %p1441_p4, 1, 0 }
   0xd   : > { %s1741_s19 = scalar_select %p1446_p6, 1, 0 }
   0xe   : > { %p1451_p8 = pnand %p1090_p5, %p126_p7  ;;  %s138_s22 = sshll.u32 %s1377_s21, 4  ;;  %s139_s22 = int_to_ptr.vmem [resolvable:$true] %s138_s22 }
   0xf   : > { %s1464_s24 = sadd.s32 1, %s1375_s15   ;;  %s29_s25 = sadd.s32 1, %s1371_s14 }
  0x10   : > { %s1742_s20 = scalar_select %p1451_p8, 1, 0 }
  0x11   : > { %p1137_p9 = pneg %p1451_p8  ;;  %s26_s26 = ssub.s32 %s1375_s15, %s1464_s24 }
  0x12   : > { %s1213_s29 = scalar_lea.hbm %s1734_s2, 512 }
  0x13   : > { %p1459_p10 = pnand %p1137_p9, %p1736_p1  ;;  %p1214_p11 = scmp.ne.s32.totalorder %s1734_s2, %s1213_s29 }
  0x14   : > { %p1220_p3 = scmp.lt.u32.totalorder %s1213_s29, %s1734_s2 }
  0x15   : > { %p1215_p12 = pneg %p1459_p10 }
  0x17   : > { %p1216_p13 = pnand %p1215_p12, %p1214_p11 }
  0x19   : > { %p1217_p0 = pneg %p1216_p13 }
  0x1b   : > { %p1222_p5 = pnand %p1220_p3, %p1217_p0 }
  0x1d   : > { %1225 = shalt.err (!%p1222_p5)
}
  0x1e   : > { %s1226_s7 = scalar_lea.vmem %s139_s22, 512  ;;  %p1234_p2 = scmp.lt.s32.totalorder %s139_s22, %s139_s22 }
  0x1f   : > { %p1227_p7 = scmp.ne.s32.totalorder %s139_s22, %s1226_s7  ;;  %p1235_p6 = scmp.lt.s32.totalorder %s1226_s7, %s1226_s7 }
  0x21   : > { %p1229_p9 = pnand %p1227_p7, %p1215_p12  ;;  %p1236_p4 = por %p1235_p6, %p1234_p2 }
  0x23   : > { %p1230_p1 = pneg %p1229_p9 }
  0x25   : > { %p1237_p8 = pnand %p1236_p4, %p1230_p1 }
  0x27   : > { %1240 = shalt.err (!%p1237_p8)
}
  0x28   : > { %s1378_s8 = smov 256   ;;  %s1379_s9 = smov 16  }
  0x29   : > { %1140 = dma.hbm_to_vmem [thread:$0]  (!%p1459_p10), %s1734_s2, 512, %s139_s22, [#allocation6], %s1378_s8, %s1378_s8, %s1379_s9  }
  0x2a   : > { %p27_p11 = scmp.eq.s32.totalorder %s26_s26, 0  ;;  %p36_p2 = scmp.ne.s32.totalorder %s1371_s14, %s1367_s13 }
  0x2b   : > { %p37_p1 = scmp.eq.s32.totalorder %s1375_s15, 0  ;;  %p1153_p4 = scmp.lt.s32.totalorder %s1375_s15, 4 }
  0x2c   : > { %s1490_s17 = scalar_select %p27_p11, %s1371_s14, %s29_s25  }
  0x2d   : > { %p38_p6 = por %p37_p1, %p36_p2  ;;  %p1744_p8 = scmp.eq.s32.totalorder %s1432_s16, 3 }
  0x2e   : > { %s152_s27 = sand.u32 1, %s1371_s14   ;;  %s1094_s28 = sshll.u32 %s1375_s15, 7 }
  0x2f   : > { %p1494_p12 = por %p1744_p8, %p36_p2  ;;  %s1500_s29 = sshll.u32 %s152_s27, 3 }
  0x30   : > { %s1505_s22 = scalar_lea.hbm %s1732_s0, %s1094_s28  ;;  %s156_s25 = scalar_lea.vmem [#allocation2], %s1500_s29 }
  0x31   : > { %s1745_s21 = scalar_select %p1494_p12, 1, 0 }
  0x32   : > { %s163_s26 = sshll.u32 %s156_s25, 4  ;;  %p1508_p10 = pnand %p1153_p4, %p38_p6  ;;  %s1512_s26 = int_to_ptr.vmem [resolvable:$true] %s163_s26 }
  0x33   : > { %s1517_s7 = scalar_lea.hbm %s1733_s1, %s1094_s28  ;;  %s153_s8 = scalar_lea.sflag [#allocation3], %s152_s27 }
  0x34   : > { %s1241_s9 = scalar_lea.hbm %s1505_s22, 128  ;;  %p1243_p0 = pneg %p1508_p10 }
  0x35   : > { %p1242_p13 = scmp.ne.s32.totalorder %s1505_s22, %s1241_s9  ;;  %s1246_s23 = scalar_lea.hbm %s1732_s0, 512 }
  0x36   : > { %p1247_p7 = scmp.lt.u32.totalorder %s1505_s22, %s1732_s0  ;;  %p1248_p9 = scmp.lt.u32.totalorder %s1246_s23, %s1241_s9 }
  0x37   : > { %p1244_p3 = pnand %p1243_p0, %p1242_p13  ;;  %p1250_p2 = scmp.lt.u32.totalorder %s1241_s9, %s1505_s22 }
  0x38   : > { %p1249_p11 = por %p1248_p9, %p1247_p7 }
  0x39   : > { %p1245_p5 = pneg %p1244_p3 }
  0x3a   : > { %p1251_p1 = por %p1250_p2, %p1249_p11 }
  0x3c   : > { %p1252_p4 = pnand %p1251_p1, %p1245_p5 }
  0x3e   : > { %1255 = shalt.err (!%p1252_p4)
}
  0x3f   : > { %s1256_s27 = scalar_lea.vmem %s1512_s26, 128  ;;  %s1380_s28 = smov [#allocation2]  }
  0x40   : > { %p1257_p6 = scmp.ne.s32.totalorder %s1512_s26, %s1256_s27  ;;  %s1261_s5 = sshll.u32 %s1380_s28, 4  ;;  %s1262_s5 = int_to_ptr.vmem [resolvable:$false] %s1261_s5 }
  0x41   : > { %s1263_s6 = scalar_lea.vmem %s1262_s5, 256  ;;  %p1264_p3 = scmp.lt.s32.totalorder %s1512_s26, %s1262_s5 }
  0x42   : > { %p1259_p8 = pnand %p1257_p6, %p1243_p0  ;;  %p1265_p7 = scmp.lt.s32.totalorder %s1263_s6, %s1256_s27 }
  0x44   : > { %p1260_p13 = pneg %p1259_p8  ;;  %p1266_p9 = por %p1265_p7, %p1264_p3 }
  0x46   : > { %p1267_p11 = pnand %p1266_p9, %p1260_p13 }
  0x48   : > { %1270 = shalt.err (!%p1267_p11)
}
  0x49   : > { %1144 = dma.hbm_to_vmem [thread:$0]  (!%p1508_p10), %s1505_s22, 128, %s1512_s26, %s153_s8  }
  0x4a   : > { %s170_s9 = sand.u32 1, %s1375_s15   ;;  %s174_s10 = scalar_lea.vmem [#allocation5], %s1500_s29 }
  0x4b   : > { %s181_s11 = sshll.u32 %s174_s10, 4  ;;  %s171_s23 = scalar_lea.sflag [#allocation6], %s170_s9  ;;  %s182_s11 = int_to_ptr.vmem [resolvable:$true] %s181_s11 }
  0x4c   : > { %s1271_s30 = scalar_lea.hbm %s1517_s7, 128  ;;  %s1276_s28 = scalar_lea.hbm %s1733_s1, 512 }
  0x4d   : > { %p1272_p5 = scmp.ne.s32.totalorder %s1517_s7, %s1271_s30  ;;  %p1277_p4 = scmp.lt.u32.totalorder %s1517_s7, %s1733_s1 }
  0x4e   : > { %p1278_p6 = scmp.lt.u32.totalorder %s1276_s28, %s1271_s30  ;;  %p1280_p13 = scmp.lt.u32.totalorder %s1271_s30, %s1517_s7 }
  0x4f   : > { %p1274_p2 = pnand %p1272_p5, %p1243_p0 }
  0x50   : > { %p1279_p8 = por %p1278_p6, %p1277_p4 }
  0x51   : > { %p1275_p1 = pneg %p1274_p2 }
  0x52   : > { %p1281_p3 = por %p1280_p13, %p1279_p8 }
  0x54   : > { %p1282_p7 = pnand %p1281_p3, %p1275_p1 }
  0x56   : > { %1285 = shalt.err (!%p1282_p7)
}
  0x57   : > { %s1286_s29 = scalar_lea.vmem %s182_s11, 128  ;;  %s1381_s22 = smov [#allocation5]  }
  0x58   : > { %p1287_p9 = scmp.ne.s32.totalorder %s182_s11, %s1286_s29  ;;  %s1291_s26 = sshll.u32 %s1381_s22, 4  ;;  %s1292_s26 = int_to_ptr.vmem [resolvable:$false] %s1291_s26 }
  0x59   : > { %s1293_s8 = scalar_lea.vmem %s1292_s26, 256  ;;  %p1294_p2 = scmp.lt.s32.totalorder %s182_s11, %s1292_s26 }
  0x5a   : > { %p1289_p11 = pnand %p1287_p9, %p1243_p0  ;;  %p1295_p12 = scmp.lt.s32.totalorder %s1293_s8, %s1286_s29 }
  0x5c   : > { %p1290_p5 = pneg %p1289_p11  ;;  %p1296_p4 = por %p1295_p12, %p1294_p2 }
  0x5e   : > { %p1297_p6 = pnand %p1296_p4, %p1290_p5 }
  0x60   : > { %1300 = shalt.err (!%p1297_p6)
}
  0x61   : > { %1147 = dma.hbm_to_vmem [thread:$0]  (!%p1508_p10), %s1517_s7, 128, %s182_s11, %s171_s23  }
  0x62   : > { %p1747_p1 = scmp.ne.s32.totalorder %s1742_s20, 0 }
  0x63   : > { %s1568_s9 = sand.u32 (!%p1747_p1), 1, %s1367_s13   ;;  %p1748_p0 = scmp.ne.s32.totalorder (!%p1747_p1), %s1740_s18, 0 }
  0x64   : > { %190 = sbr.rel (%p1747_p1) target bundleno = 997 (0x3e5), region = 32  ;;  %s1098_s10 = sshll.u32 (!%p1747_p1), %s1568_s9, 3 }
  0x65   : > { %s193_s30 = scalar_lea.sflag (!%p1747_p1), [#allocation3], %s1568_s9  ;;  %s196_s25 = scalar_lea.vmem (!%p1747_p1), [#allocation2], %s1098_s10 }
  0x6b   : > { %1346 = dma.done.wait (%p1748_p0), %s193_s30, 128  }
  0x6c   : > { %1348 = vsyncadd (%p1748_p0), %s193_s30, 4294967168  ;;  %s201_s4 = sand.u32 1, %s1432_s16   ;;  %s1577_s20 = scalar_lea.vmem [#allocation5], %s1098_s10 }
  0x6d   : > { %s202_s7 = scalar_lea.sflag [#allocation6], %s201_s4 }
  0x6e   : > { %1350 = dma.done.wait (%p1748_p0), %s202_s7, 128  }
  0x6f   : > { %1352 = vsyncadd (%p1748_p0), %s202_s7, 4294967168  ;;  %p1749_p12 = scmp.eq.s32.totalorder %s1432_s16, 0 }
  0x71   : > { %1354 = dma.done.wait (%p1749_p12), [#allocation6], 512   ;;  %p1750_p10 = pmov %p1749_p12 }
  0x72   : > { %v1382_v0 = vmov 3   ;;  %v1383_v1 = vmov 2   ;;  %v237_v2 = vld [vmem:[%s196_s25] sm:$0xff]  ;;  %v1384_v3 = vmov 1   ;;  %v1385_v4 = vmov 0   ;;  %s1101_s18 = sshll.u32 %s1568_s9, 4 }
  0x73   : > { %1356 = vsyncadd (%p1750_p10), [#allocation6], 4294966784  ;;  %1201 = vset.pattern.permute.xlu1 %v1382_v0  ;;  %1199 = vset.pattern.permute.xlu0 %v1383_v1  ;;  %v1386_v5 = vmov 4   ;;  %v248_v6 = vlaneseq  ;;  %v1592_v10 = vld [vmem:[#allocation7] sm:$0xff]  ;;  %v1594_v11 = vld [vmem:[#allocation7 + $0x8] sm:$0xff]  ;;  %vm426_vm8 = vcmask 64512  }
  0x74   : > { %277 = vperm.xlu1 %1201, %v237_v2   ;;  %245 = vperm.xlu0 %1199, %v237_v2   ;;  %s1661_s11 = scalar_lea.vmem [#allocation8], %s1101_s18  ;;  %s1116_s23 = sshll.u32 %s1432_s16, 8 }
  0x75   : > { %v1588_v7 = vshrl.u32 %v248_v6, 7  ;;  %v333_v57 = vand.u32 127, %v248_v6  ;;  %s987_s27 = sshll.u32 %s1661_s11, 4  ;;  %s1687_s6 = scalar_lea.hbm %s1735_s3, %s1116_s23  ;;  %s1689_s27 = int_to_ptr.vmem [resolvable:$true] %s987_s27 }
  0x76   : > { %s973_s29 = scalar_lea.sflag [#allocation4], %s1568_s9  ;;  %s1301_s22 = scalar_lea.vmem %s1689_s27, 256 }
  0x77   : > { %v282_v8 = vsub.s32 3, %v1588_v7  ;;  %v250_v9 = vsub.s32 2, %v1588_v7  ;;  %v296_v12 = vsub.s32 1, %v1588_v7  ;;  %v264_v13 = vsub.s32 0, %v1588_v7  ;;  %p1302_p8 = scmp.ne.s32.totalorder %s1689_s27, %s1301_s22  ;;  %p1751_p13 = scmp.ne.s32.totalorder %s1745_s21, 0 }
  0x78   : > { %1202 = vset.pattern.permute.xlu1 %v1384_v3  ;;  %1200 = vset.pattern.permute.xlu0 %v1385_v4  ;;  %v316_v24 = vsub.s32 4, %v1588_v7  ;;  %v334_v58 = vadd.s32 128, %v333_v57  ;;  %s1390_s16 = smov [#allocation8]  }
  0x79   : > { %291 = vperm.xlu1 %1202, %v237_v2   ;;  %259 = vperm.xlu0 %1200, %v237_v2   ;;  %v283_v16 = vrot.slane %v1592_v10, %v282_v8  ;;  %v287_v17 = vrot.slane %v1594_v11, %v282_v8  ;;  %v251_v18 = vrot.slane %v1592_v10, %v250_v9  ;;  %p1303_p3 = pnand %p1302_p8, %p1751_p13  ;;  %s1305_s26 = sshll.u32 %s1390_s16, 4  ;;  %s1306_s26 = int_to_ptr.vmem [resolvable:$false] %s1305_s26 }
  0x7a   : > { %v255_v19 = vrot.slane %v1594_v11, %v250_v9  ;;  %v297_v20 = vrot.slane %v1592_v10, %v296_v12  ;;  %v301_v21 = vrot.slane %v1594_v11, %v296_v12  ;;  %v265_v22 = vrot.slane %v1592_v10, %v264_v13  ;;  %s1307_s8 = scalar_lea.vmem %s1306_s26, 512  ;;  %p1308_p9 = scmp.lt.s32.totalorder %s1689_s27, %s1306_s26 }
  0x7b   : > { %v269_v23 = vrot.slane %v1594_v11, %v264_v13  ;;  %v317_v35 = vrot.slane %v1592_v10, %v316_v24  ;;  %v321_v36 = vrot.slane %v1594_v11, %v316_v24  ;;  %p1304_p7 = pneg %p1303_p3  ;;  %p1309_p11 = scmp.lt.s32.totalorder %s1307_s8, %s1301_s22 }
  0x7d   : > { %1203 = vset.pattern.permute.xlu1 %v1386_v5  ;;  %1204 = vset.pattern.permute.xlu0 %v1386_v5  ;;  %v1387_v5 = vmov 0.0   ;;  %p1310_p5 = por %p1309_p11, %p1308_p9 }
  0x7e   : > { %311 = vperm.xlu1 %1203, %v237_v2   ;;  %733 = vmatprep.mubr.f32.mxu0 %v1387_v5  ;;  %970 = vst [vmem:[%s1661_s11] sm:$0xe0] %v1387_v5  ;;  %971 = vst [vmem:[%s1661_s11 + $0x8] sm:$0xe0] %v1387_v5 }
  0x7f   : > { %496 = vmatprep.mubr.f32.mxu1 %v1387_v5  ;;  %p1311_p2 = pnand %p1310_p5, %p1304_p7 }
  0xf3   : > { %v278_v14 = vpop.permute.xlu1 %277  ;;  %v246_v15 = vpop.permute.xlu0 %245 }
  0xf4   : > { %v288_v25 = vmin.f32 %v278_v14, %v283_v16  ;;  %v289_v26 = vmin.f32 %v278_v14, %v287_v17  ;;  %v256_v27 = vmin.f32 %v246_v15, %v251_v18  ;;  %v257_v28 = vmin.f32 %v246_v15, %v255_v19 }
  0xf8   : > { %v292_v29 = vpop.permute.xlu1 %291  ;;  %v260_v30 = vpop.permute.xlu0 %259 }
  0xf9   : > { %v302_v31 = vmax.f32 %v292_v29, %v297_v20  ;;  %v303_v32 = vmax.f32 %v292_v29, %v301_v21  ;;  %v270_v33 = vmax.f32 %v260_v30, %v265_v22  ;;  %v271_v34 = vmax.f32 %v260_v30, %v269_v23 }
  0xfb   : > { %v304_v37 = vsub.f32 %v288_v25, %v302_v31  ;;  %v305_v38 = vsub.f32 %v289_v26, %v303_v32  ;;  %v272_v39 = vsub.f32 %v256_v27, %v270_v33  ;;  %v273_v40 = vsub.f32 %v257_v28, %v271_v34  ;;  %v238_v28 = vld [vmem:[%s1577_s20] sm:$0xff] }
  0xfc   : > { %v428_v34 = vsel %vm426_vm8, %v238_v28, 0  ;;  %v906_v28 = vrot.slane %v1592_v10, 7 }
  0xfd   : > { %v306_v41 = vmax.f32 %v304_v37, 0.0  ;;  %v307_v42 = vmax.f32 %v305_v38, 0.0  ;;  %v274_v43 = vmax.f32 %v272_v39, 0.0  ;;  %v275_v44 = vmax.f32 %v273_v40, 0.0  ;;  %v312_v45 = vpop.permute.xlu1 %311 }
  0xfe   : > { %v322_v46 = vadd.f32 %v317_v35, %v312_v45  ;;  %v323_v47 = vadd.f32 %v321_v36, %v312_v45  ;;  %v1621_v37 = vand.u32 4294901760, %v428_v34 }
  0xff   : > { %v308_v48 = vmul.f32 %v306_v41, %v274_v43  ;;  %v309_v49 = vmul.f32 %v307_v42, %v275_v44 }
 0x100   : > { %v1626_v43 = vsub.f32 %v428_v34, %v1621_v37 }
 0x101   : > { %v324_v50 = vsub.f32 %v322_v46, %v308_v48  ;;  %v325_v51 = vsub.f32 %v323_v47, %v309_v49 }
 0x103   : > { %1205 = vrcp.f32 %v324_v50 }
 0x104   : > { %1207 = vrcp.f32 %v325_v51  ;;  %v499_v51 = vand.u32 4294901760, %v1626_v43 }
 0x10d   : > { %v1206_v52 = vpop.eup %1205 }
 0x10e   : > { %v1208_v53 = vpop.eup %1207  ;;  %v327_v54 = vmul.f32 %v1206_v52, %v308_v48 }
 0x10f   : > { %v329_v55 = vmul.f32 %v1208_v53, %v309_v49 }
 0x110   : > { %v335_v8 = vrot.slane %v327_v54, 4 }
 0x111   : > { %v369_v56 = vmax.f32 %v327_v54, %v329_v55  ;;  %v341_v9 = vrot.slane %v329_v55, 4 }
 0x112   : > { %v336_v12 = vmax.f32 %v327_v54, %v335_v8 }
 0x113   : > { %370 = vmax.xlane.f32.xlu0 %v369_v56  ;;  %v342_v13 = vmax.f32 %v329_v55, %v341_v9  ;;  %v500_v56 = vsub.f32 %v1626_v43, %v499_v51 }
 0x114   : > { %v337_v14 = vrot.slane %v336_v12, 2 }
 0x115   : > { %v343_v15 = vrot.slane %v342_v13, 2 }
 0x116   : > { %v338_v16 = vmax.f32 %v336_v12, %v337_v14 }
 0x117   : > { %v344_v17 = vmax.f32 %v342_v13, %v343_v15 }
 0x118   : > { %v339_v18 = vrot.slane %v338_v16, 1 }
 0x119   : > { %v345_v19 = vrot.slane %v344_v17, 1 }
 0x11a   : > { %v1612_v20 = vmax.f32 %v338_v16, %v339_v18  ;;  %v241_v16 = vld [vmem:[#allocation7 + $0x10] sm:$0xff]  ;;  %v1389_v18 = vmov 1966171168  }
 0x11b   : > { %v1614_v21 = vmax.f32 %v344_v17, %v345_v19  ;;  %v242_v17 = vld [vmem:[#allocation7 + $0x18] sm:$0xff]  ;;  %v949_v19 = vunpack.c.l.s4 %v1389_v18 }
 0x11c   : > { %vm347_vm4 = vcmp.eq.f32.partialorder %v327_v54, %v1612_v20 }
 0x11d   : > { %vm348_vm5 = vcmp.eq.f32.partialorder %v329_v55, %v1614_v21  ;;  %v349_v22 = vsel %vm347_vm4, %v1588_v7, 8 }
 0x11e   : > { %v350_v23 = vsel %vm348_vm5, %v1588_v7, 8  ;;  %v351_v24 = vrot.slane %v349_v22, 4 }
 0x11f   : > { %v360_v25 = vrot.slane %v350_v23, 4 }
 0x120   : > { %vm352_vm6 = vcmp.lt.s32.totalorder %v349_v22, %v351_v24 }
 0x121   : > { %vm361_vm7 = vcmp.lt.s32.totalorder %v350_v23, %v360_v25  ;;  %v353_v27 = vsel %vm352_vm6, %v349_v22, %v351_v24  ;;  %v919_v24 = vrot.slane %v241_v16, 5 }
 0x122   : > { %v362_v29 = vsel %vm361_vm7, %v350_v23, %v360_v25  ;;  %v354_v33 = vrot.slane %v353_v27, 2  ;;  %v897_v23 = vrot.slane %v1592_v10, 5 }
 0x123   : > { %v363_v35 = vrot.slane %v362_v29, 2 }
 0x124   : > { %vm355_vm11 = vcmp.lt.s32.totalorder %v353_v27, %v354_v33 }
 0x125   : > { %vm364_vm12 = vcmp.lt.s32.totalorder %v362_v29, %v363_v35  ;;  %v356_v42 = vsel %vm355_vm11, %v353_v27, %v354_v33  ;;  %v921_v27 = vrot.slane %v242_v17, 5 }
 0x126   : > { %v365_v44 = vsel %vm364_vm12, %v362_v29, %v363_v35  ;;  %v357_v49 = vrot.slane %v356_v42, 1  ;;  %v909_v29 = vrot.slane %v1594_v11, 7 }
 0x127   : > { %v366_v50 = vrot.slane %v365_v44, 1 }
 0x1a0   : > { %v371_v59 = vpop.xlane.xlu0 %370 }
 0x1a1   : > { %vm372_vm0 = vcmp.eq.f32.partialorder %v327_v54, %v371_v59  ;;  %vm373_vm1 = vcmp.eq.f32.partialorder %v329_v55, %v371_v59 }
 0x1a2   : > { %v374_v60 = vsel %vm372_vm0, %v333_v57, 256  ;;  %v375_v61 = vsel %vm373_vm1, %v334_v58, 256  ;;  %vm358_vm1 = vcmp.lt.s32.totalorder %v356_v42, %v357_v49 }
 0x1a3   : > { %vm376_vm2 = vcmp.lt.s32.totalorder %v374_v60, %v375_v61 }
 0x1a4   : > { %v377_v62 = vsel %vm376_vm2, %v374_v60, %v375_v61  ;;  %vm367_vm2 = vcmp.lt.s32.totalorder %v365_v44, %v366_v50 }
 0x1a5   : > { %v379_v63 = vshra.s32 %v377_v62, 16  ;;  %v378_v1 = vand.u32 65535, %v377_v62  ;;  %v368_v60 = vsel %vm367_vm2, %v365_v44, %v366_v50 }
 0x1a7   : > { %v381_v0 = vcvt.s32.f32 %v379_v63  ;;  %v380_v3 = vcvt.s32.f32 %v378_v1  ;;  %v501_v63 = vand.u32 4294901760, %v500_v56  ;;  %v1388_v1 = vmov 1.0  }
 0x1a9   : > { %382 = vmin.xlane.f32.xlu1 %v381_v0 }
 0x236   : > { %v383_v2 = vpop.xlane.xlu1 %382 }
 0x237   : > { %vm384_vm3 = vcmp.eq.f32.partialorder %v381_v0, %v383_v2  ;;  %v389_v26 = vcvt.f32.s32 %v383_v2 }
 0x238   : > { %v385_v4 = vsel %vm384_vm3, %v380_v3, inf }
 0x239   : > { %386 = vmin.xlane.f32.xlu0 %v385_v4  ;;  %v390_v31 = vshll.u32 %v389_v26, 16  ;;  %v898_v26 = vrot.slane %v1594_v11, 5 }
 0x2c6   : > { %v387_v30 = vpop.xlane.xlu0 %386 }
 0x2c7   : > { %v388_v32 = vcvt.f32.s32 %v387_v30  ;;  %v910_v30 = vrot.slane %v242_v17, 7 }
 0x2c9   : > { %v391_v36 = vadd.s32 %v390_v31, %v388_v32  ;;  %v950_v32 = vunpack.c.0.s8 %v949_v19 }
 0x2cb   : > { %vm392_vm9 = vcmp.eq.s32.totalorder %v391_v36, %v333_v57  ;;  %vm393_vm10 = vcmp.eq.s32.totalorder %v391_v36, %v334_v58  ;;  %v359_v58 = vsel %vm358_vm1, %v356_v42, %v357_v49 }
 0x2cc   : > { %v394_v38 = vsel %vm392_vm9, %v1588_v7, 4294967295  ;;  %v395_v39 = vsel %vm393_vm10, %v1588_v7, 4294967295  ;;  %vm918_vm9 = vcmask 1042432   ;;  %vm905_vm10 = vcmask 1040384  }
 0x2cd   : > { %v396_v40 = vrot.slane %v394_v38, 4  ;;  %v405_v41 = vrot.slane %v395_v39, 4  ;;  %v920_v33 = vsel %vm918_vm9, %v897_v23, %v919_v24  ;;  %v922_v36 = vsel %vm918_vm9, %v898_v26, %v921_v27 }
 0x2cf   : > { %vm397_vm13 = vcmp.gt.s32.totalorder %v394_v38, %v396_v40  ;;  %vm406_vm14 = vcmp.gt.s32.totalorder %v395_v39, %v405_v41 }
 0x2d0   : > { %v398_v45 = vsel %vm397_vm13, %v394_v38, %v396_v40  ;;  %v407_v46 = vsel %vm406_vm14, %v395_v39, %v405_v41  ;;  %v911_v38 = vsel %vm905_vm10, %v909_v29, %v910_v30  ;;  %v953_v41 = vsub.s32 %v950_v32, %v1588_v7 }
 0x2d1   : > { %v399_v47 = vrot.slane %v398_v45, 2  ;;  %v408_v48 = vrot.slane %v407_v46, 2 }
 0x2d3   : > { %vm400_vm15 = vcmp.gt.s32.totalorder %v398_v45, %v399_v47  ;;  %vm409_vm0 = vcmp.gt.s32.totalorder %v407_v46, %v408_v48 }
 0x2d4   : > { %v410_v52 = vsel %vm409_vm0, %v407_v46, %v408_v48  ;;  %v401_v53 = vsel %vm400_vm15, %v398_v45, %v399_v47  ;;  %vm965_vm15 = vcmp.lt.s32.totalorder %v248_v6, 256 }
 0x2d5   : > { %v411_v54 = vrot.slane %v410_v52, 1  ;;  %v402_v55 = vrot.slane %v401_v53, 1 }
 0x2d7   : > { %vm412_vm3 = vcmp.gt.s32.totalorder %v410_v52, %v411_v54  ;;  %vm403_vm4 = vcmp.gt.s32.totalorder %v401_v53, %v402_v55 }
 0x2d8   : > { %v413_v57 = vsel %vm412_vm3, %v410_v52, %v411_v54  ;;  %v404_v59 = vsel %vm403_vm4, %v401_v53, %v402_v55 }
 0x2d9   : > { %vm415_vm5 = vcmp.ge.s32.totalorder %v413_v57, 0  ;;  %vm414_vm6 = vcmp.ge.s32.totalorder %v404_v59, 0 }
 0x2da   : > { %v417_v61 = vsel %vm415_vm5, %v413_v57, %v368_v60  ;;  %v416_v62 = vsel %vm414_vm6, %v404_v59, %v359_v58  ;;  %v418_v22 = vsel %vm414_vm6, 0.5, %v1612_v20  ;;  %v419_v25 = vsel %vm415_vm5, 0.5, %v1614_v21 }
 0x2db   : > { %vm421_vm7 = vcmp.eq.s32.totalorder %v417_v61, %v1588_v7  ;;  %vm420_vm8 = vcmp.eq.s32.totalorder %v416_v62, %v1588_v7  ;;  %vm933_vm11 = vcmp.lt.f32.partialorder %v418_v22, 0.5  ;;  %vm937_vm12 = vcmp.lt.f32.partialorder %v418_v22, 0.4 }
 0x2dc   : > { %v1103_v0 = vsel %vm421_vm7, 1.0, %v1387_v5  ;;  %1104 = vmatprep.subr.msk.mxu1 %vm421_vm7, %v1388_v1  ;;  %1106 = vmatprep.subr.msk.mxu0 %vm421_vm7, %v1388_v1  ;;  %v1102_v2 = vsel %vm420_vm8, 1.0, %v1387_v5  ;;  %vm934_vm13 = vcmp.lt.f32.partialorder %v419_v25, 0.5  ;;  %vm938_vm14 = vcmp.lt.f32.partialorder %v419_v25, 0.4 }
 0x2dd   : > { %v509_v3 = vsub.f32 %v1103_v0, %v1103_v0  ;;  %1105 = vmatpush1.msk.msra.mxu1 %vm420_vm8, %v1388_v1  ;;  %v515_v4 = vsub.f32 %v1102_v2, %v1102_v2  ;;  %1107 = vmatpush1.msk.msra.mxu0 %vm420_vm8, %v1388_v1 }
 0x2de   : > { %737 = vmatmul.mubr.f32.vlgmr.msra.gmra.mrb[0].mxu0 %v499_v51  ;;  %502 = vmatmul.mubr.f32.vlgmr.msra.gmra.mrb[0].mxu1 %v501_v63 }
 0x2df   : > { %v510_v8 = vand.u32 4294901760, %v509_v3  ;;  %v516_v9 = vand.u32 4294901760, %v515_v4  ;;  %813 = vmatprep.mubr.f32.mxu0 %v1387_v5  ;;  %582 = vmatprep.mubr.f32.mxu1 %v1387_v5 }
 0x2e1   : > { %746 = vmatprep.subr.mxu0 %v510_v8  ;;  %v511_v12 = vsub.f32 %v509_v3, %v510_v8  ;;  %v517_v13 = vsub.f32 %v515_v4, %v516_v9 }
 0x2e2   : > { %750 = vmatpush1.msra.mxu0 %v516_v9 }
 0x2e3   : > { %1108 = vmatprep.subr.msk.mxu0 %vm421_vm7, %v1388_v1  ;;  %v512_v14 = vand.u32 4294901760, %v511_v12  ;;  %v518_v15 = vand.u32 4294901760, %v517_v13 }
 0x2e5   : > { %513 = vmatprep.subr.mxu1 %v512_v14 }
 0x2e6   : > { %519 = vmatpush1.msra.mxu1 %v518_v15  ;;  %815 = vmatmul.mubr.f32.vlgmr.msra.gmra.mrb[0].mxu0 %v1621_v37 }
 0x2e7   : > { %1109 = vmatpush1.msk.msra.mxu0 %vm420_vm8, %v1388_v1  ;;  %584 = vmatmul.mubr.f32.vlgmr.msra.gmra.mrb[0].mxu1 %v1621_v37 }
 0x2e8   : > { %592 = vmatprep.subr.mxu1 %v509_v3  ;;  %887 = vmatprep.mubr.f32.mxu0 %v1387_v5 }
 0x2e9   : > { %595 = vmatpush1.msra.mxu1 %v515_v4  ;;  %658 = vmatprep.mubr.f32.mxu1 %v1387_v5  ;;  %v907_v5 = vrot.slane %v241_v16, 7 }
 0x2ee   : > { %889 = vmatmul.mubr.f32.vlgmr.msra.gmra.mrb[0].mxu0 %v1621_v37  ;;  %v908_v37 = vsel %vm905_vm10, %v906_v28, %v907_v5 }
 0x2ef   : > { %661 = vmatmul.mubr.f32.vlgmr.msra.gmra.mrb[0].mxu1 %v1626_v43 }
 0x3c1   : > { %v890_v31 = vpop.f32.mrb[0].mxu0 }
 0x3c2   : > { %v662_v20 = vpop.f32.mrb[0].mxu1  ;;  %v892_v34 = vpop.f32.mrb[1].mxu0 }
 0x3c3   : > { %v1117_v35 = vadd.f32 %v890_v31, %v662_v20  ;;  %v664_v21 = vpop.f32.mrb[1].mxu1 }
 0x3c4   : > { %v1118_v10 = vadd.f32 %v892_v34, %v664_v21 }
 0x3c5   : > { %v901_v11 = vsub.f32 %v1117_v35, %v897_v23  ;;  %v925_v39 = vmul.f32 %v1117_v35, %v920_v33  ;;  %v935_v40 = vsel %vm933_vm11, -1.0, %v1117_v35 }
 0x3c6   : > { %v939_v42 = vsel %vm937_vm12, 0.0, %v935_v40  ;;  %v902_v43 = vsub.f32 %v1118_v10, %v898_v26  ;;  %v926_v44 = vmul.f32 %v1118_v10, %v922_v36  ;;  %v936_v45 = vsel %vm934_vm13, -1.0, %v1118_v10 }
 0x3c7   : > { %v914_v46 = vmul.f32 %v908_v37, %v901_v11  ;;  %1209 = vlog2.f32 %v925_v39  ;;  %v940_v47 = vsel %vm938_vm14, 0.0, %v936_v45 }
 0x3c8   : > { %v915_v48 = vmul.f32 %v911_v38, %v902_v43  ;;  %1211 = vlog2.f32 %v926_v44  ;;  %v947_v49 = vcombine.high %v939_v42, %v940_v47 }
 0x3c9   : > { %v916_v50 = vmul.f32 10.0, %v914_v46 }
 0x3ca   : > { %v917_v51 = vmul.f32 10.0, %v915_v48  ;;  %v954_v52 = vrot.slane %v947_v49, %v953_v41 }
 0x3cb   : > { %941 = vst [vmem:[%s1661_s11] sm:$0x3] %v916_v50 }
 0x3cc   : > { %942 = vst [vmem:[%s1661_s11 + $0x8] sm:$0x3] %v917_v51  ;;  %v961_v7 = vrot.slane %v954_v52, %v953_v41 }
 0x3ce   : > { %1110 = vst.msk [vmem:[%s1661_s11 + $0x4] ss:$8 sm:$0x3] %vm965_vm15, %v961_v7 }
 0x3d1   : > { %v1210_v53 = vpop.eup %1209 }
 0x3d2   : > { %v1212_v54 = vpop.eup %1211  ;;  %v928_v55 = vmul.f32 0.6931472, %v1210_v53 }
 0x3d3   : > { %v930_v56 = vmul.f32 0.6931472, %v1212_v54 }
 0x3d4   : > { %v931_v57 = vmul.f32 5.0, %v928_v55 }
 0x3d5   : > { %v932_v58 = vmul.f32 5.0, %v930_v56 }
 0x3d6   : > { %943 = vst [vmem:[%s1661_s11] sm:$0xc] %v931_v57 }
 0x3d7   : > { %944 = vst [vmem:[%s1661_s11 + $0x8] sm:$0xc] %v932_v58 }
 0x3d8   : > { %1314 = shalt.err (!%p1311_p2)
}
 0x3d9   : > { %s1315_s9 = scalar_lea.hbm %s1687_s6, 256  ;;  %s1319_s25 = scalar_lea.hbm %s1735_s3, 1024 }
 0x3da   : > { %p1316_p4 = scmp.ne.s32.totalorder %s1687_s6, %s1315_s9  ;;  %p1320_p0 = scmp.lt.u32.totalorder %s1687_s6, %s1735_s3 }
 0x3db   : > { %p1321_p12 = scmp.lt.u32.totalorder %s1319_s25, %s1315_s9  ;;  %p1323_p8 = scmp.lt.u32.totalorder %s1315_s9, %s1687_s6 }
 0x3dc   : > { %p1317_p6 = pnand %p1316_p4, %p1751_p13 }
 0x3dd   : > { %p1322_p10 = por %p1321_p12, %p1320_p0 }
 0x3de   : > { %p1318_p1 = pneg %p1317_p6 }
 0x3df   : > { %p1324_p3 = por %p1323_p8, %p1322_p10 }
 0x3e1   : > { %p1325_p7 = pnand %p1324_p3, %p1318_p1 }
 0x3e3   : > { %1328 = shalt.err (!%p1325_p7)
}
 0x3e4   : > { %1135 = dma.vmem_to_hbm [thread:$0]  (%p1751_p13), %s1689_s27, 256, %s1687_s6, %s973_s29  }
 0x3e5 PF: > { %p1155_p9 = scmp.ge.s32.totalorder %s1375_s15, 2  ;;  %s999_s20 = sand.u32 1, %s1363_s12  }
 0x3e6   : > { %p1752_p11 = scmp.ne.s32.totalorder %s1741_s19, 0  ;;  %s1000_s18 = scalar_lea.sflag [#allocation4], %s999_s20 }
 0x3e8   : > { %p1149_p5 = pnand %p1155_p9, %p1752_p11 }
 0x3ea   : > { %1358 = dma.done.wait (!%p1149_p5), %s1000_s18, 256  }
 0x3eb   : > { %1360 = vsyncadd (!%p1149_p5), %s1000_s18, 4294967040  ;;  %p19_p2 = scmp.ge.s32.totalorder %s1464_s24, 6   ;;  %s1753_s12 = smov %s1367_s13 }
 0x3ec   : > { %s1754_s13 = smov %s1371_s14  ;;  %s1755_s14 = smov %s1490_s17 }
 0x3ed   : > { %s1756_s15 = smov %s1464_s24  ;;  %21 = sbr.rel (!%p19_p2) target bundleno = 7 (0x7), region = 95 }
 0x3f4   :  { %1005 = vsyncpa [#allocation3], 1 }
 0x3f5   :  { %1007 = vsyncpa [#allocation3 + $0x1], 1 }
 0x3f6   :  { %1008 = vsyncpa [#allocation6], 1 }
 0x3f7   :  { %1010 = vsyncpa [#allocation6 + $0x1], 1 }
 0x3f8   :  { %1011 = vsyncpa [#allocation4], 1 }
 0x3f9   :  { %1013 = vsyncpa [#allocation4 + $0x1], 1 }

</bundles_post_ra>
